<compile_context>
chip_gen: v6e
topology: v6e:2x2x1
jax: 0.10.0
libtpu: 0.0.40
codegen_flags: <defaults>
</compile_context>

<pallas_src>
import functools

import jax
import jax.numpy as jnp
from jax.experimental import pallas as pl
from jax.experimental.pallas import tpu as pltpu

N_CLASSES = 10
H0, H1 = 100, 50
LANE = 128  # pad feature dims to full 128-lane vregs / MXU columns


def _round_up(n, m):
    return ((n + m - 1) // m) * m


def mlp_kernel(x_ref, w0_ref, b0_ref, w1_ref, b1_ref, w2_ref, b2_ref, o_ref):
    # fc0 + ReLU  (MXU matmul with f32 accumulation; bias/ReLU in f32 on the VPU)
    h0 = jnp.dot(x_ref[...], w0_ref[...], preferred_element_type=jnp.float32)
    h0 = jnp.maximum(h0 + b0_ref[...], 0.0)

    # fc1 + ReLU
    h1 = jnp.dot(h0.astype(w1_ref.dtype), w1_ref[...],
                 preferred_element_type=jnp.float32)
    h1 = jnp.maximum(h1 + b1_ref[...], 0.0)

    # fc2 -> 128-lane padded logits
    logits = jnp.dot(h1.astype(w2_ref.dtype), w2_ref[...],
                     preferred_element_type=jnp.float32)
    logits = logits + b2_ref[...]

    # mask the padded logit lanes to -inf so they vanish from the log-softmax
    lane = jax.lax.broadcasted_iota(jnp.int32, logits.shape, 1)
    masked = jnp.where(lane < N_CLASSES, logits, -jnp.inf)

    # numerically stable log_softmax over dim=1
    m = jnp.max(masked, axis=1, keepdims=True)
    shifted = masked - m
    lse = jnp.log(jnp.sum(jnp.exp(shifted), axis=1, keepdims=True))
    o_ref[...] = (shifted - lse)[:, :N_CLASSES]


@functools.partial(jax.jit, static_argnames=("block_rows", "compute_dtype"))
def model_a_forward(x, params, *, block_rows=512, compute_dtype=jnp.float32):
    """x: any shape whose trailing dims flatten to image_size (NCHW images ok)."""
    w0, b0, w1, b1, w2, b2 = params  # weights as (in_features, out_features)
    image_size = w0.shape[0]

    x2d = x.reshape(-1, image_size).astype(compute_dtype)  # == torch x.view(-1, image_size)
    batch = x2d.shape[0]

    # batch tiling: one grid step per `tm` rows (pipelined DMA + megacore sharding)
    tm = min(block_rows, _round_up(batch, 8))
    b_pad = _round_up(batch, tm)
    if b_pad != batch:
        x2d = jnp.pad(x2d, ((0, b_pad - batch), (0, 0)))

    # pad feature dims to 128 lanes (zeros are inert through matmul + ReLU;
    # padded logit lanes are masked inside the kernel)
    def pad2(a, rows, cols):
        return jnp.pad(a, ((0, rows - a.shape[0]), (0, cols - a.shape[1])))

    w0p = pad2(w0, image_size, LANE).astype(compute_dtype)
    w1p = pad2(w1, LANE, LANE).astype(compute_dtype)
    w2p = pad2(w2, LANE, LANE).astype(compute_dtype)
    b0p = pad2(b0, 1, LANE).astype(jnp.float32)
    b1p = pad2(b1, 1, LANE).astype(jnp.float32)
    b2p = pad2(b2, 1, LANE).astype(jnp.float32)

    # weights/biases: constant index_map -> stay resident in VMEM across the grid
    resident = lambda a: pl.BlockSpec(a.shape, lambda i: (0,) * a.ndim)

    out = pl.pallas_call(
        mlp_kernel,
        out_shape=jax.ShapeDtypeStruct((b_pad, N_CLASSES), jnp.float32),
        grid=(b_pad // tm,),
        in_specs=[
            pl.BlockSpec((tm, image_size), lambda i: (i, 0)),  # x: tiled over batch
            resident(w0p), resident(b0p),
            resident(w1p), resident(b1p),
            resident(w2p), resident(b2p),
        ],
        out_specs=pl.BlockSpec((tm, N_CLASSES), lambda i: (i, 0)),
        compiler_params=pltpu.CompilerParams(
            dimension_semantics=("parallel",)),  # shard batch tiles across TCs (v7x)
    )(x2d, w0p, b0p, w1p, b1p, w2p, b2p)

    return out[:batch]


def init_params(key, image_size):
    """Deterministic init mirroring nn.Linear default (uniform +/- 1/sqrt(fan_in)).
    Weights stored transposed vs PyTorch, i.e. (in_features, out_features)."""
    dims = [(image_size, H0), (H0, H1), (H1, N_CLASSES)]
    params = []
    for fan_in, fan_out in dims:
        key, kw, kb = jax.random.split(key, 3)
        bound = 1.0 / jnp.sqrt(jnp.float32(fan_in))
        w = jax.random.uniform(kw, (fan_in, fan_out), jnp.float32, -bound, bound)
        b = jax.random.uniform(kb, (1, fan_out), jnp.float32, -bound, bound)
        params += [w, b]
    return tuple(params)


def reference_forward(x, params, compute_dtype=jnp.float32):
    """Pure-JAX reference; with compute_dtype=bf16 it mirrors the kernel's
    bf16-quantized inputs + f32 accumulation."""
    w0, b0, w1, b1, w2, b2 = params
    image_size = w0.shape[0]
    q = lambda a: a.astype(compute_dtype).astype(jnp.float32)
    h = q(x.reshape(-1, image_size))
    h = jnp.maximum(h @ q(w0) + b0, 0.0)
    h = jnp.maximum(q(h) @ q(w1) + b1, 0.0)
    logits = q(h) @ q(w2) + b2
    return jax.nn.log_softmax(logits, axis=1)


if __name__ == "__main__":
    image_size = 28 * 28  # MNIST-style: ModelA(image_size=784)
    batch = 2

    key = jax.random.PRNGKey(0)
    key, kx = jax.random.split(key)
    x = jax.random.normal(kx, (batch, 1, 28, 28), jnp.float32)  # NCHW images
    params = init_params(key, image_size)

    # f32 path: strict check against the pure-JAX reference
    out_f32 = jax.block_until_ready(
        model_a_forward(x, params, compute_dtype=jnp.float32))
    ref_f32 = reference_forward(x, params, jnp.float32)
    assert out_f32.shape == (batch, N_CLASSES)
    assert jnp.allclose(out_f32, ref_f32, atol=1e-5, rtol=1e-5), "f32 mismatch vs reference"

    # bf16 path (halved HBM traffic, f32 MXU accumulation) vs bf16-quantized reference
    out_bf16 = jax.block_until_ready(
        model_a_forward(x, params, compute_dtype=jnp.bfloat16))
    ref_bf16 = reference_forward(x, params, jnp.bfloat16)
    assert out_bf16.shape == (batch, N_CLASSES)
    assert jnp.allclose(out_bf16, ref_bf16, atol=2e-3, rtol=2e-3), "bf16 mismatch vs reference"

    print("KERNEL_OK")
</pallas_src>

<mosaic_0001>
module attributes {stable_mosaic.version = 11 : i64} {
  func.func @mlp_kernel(%arg0: i32, %arg1: memref<8x784xf32, #tpu.memory_space<vmem>>, %arg2: memref<784x128xf32, #tpu.memory_space<vmem>>, %arg3: memref<1x128xf32, #tpu.memory_space<vmem>>, %arg4: memref<128x128xf32, #tpu.memory_space<vmem>>, %arg5: memref<1x128xf32, #tpu.memory_space<vmem>>, %arg6: memref<128x128xf32, #tpu.memory_space<vmem>>, %arg7: memref<1x128xf32, #tpu.memory_space<vmem>>, %arg8: memref<8x10xf32, #tpu.memory_space<vmem>>) attributes {dimension_semantics = [#tpu.dimension_semantics<parallel>], iteration_bounds = array<i64: 1>, scalar_prefetch = 0 : i64, scratch_operands = 0 : i64, tpu.core_type = #tpu.core_type<tc>, window_params = [{transform_indices = @transform_0, window_bounds = array<i64: 8, 784>}, {pipeline_mode = #tpu.pipeline_mode<synchronous>, transform_indices = @transform_1, window_bounds = array<i64: 784, 128>}, {pipeline_mode = #tpu.pipeline_mode<synchronous>, transform_indices = @transform_2, window_bounds = array<i64: 1, 128>}, {pipeline_mode = #tpu.pipeline_mode<synchronous>, transform_indices = @transform_3, window_bounds = array<i64: 128, 128>}, {pipeline_mode = #tpu.pipeline_mode<synchronous>, transform_indices = @transform_4, window_bounds = array<i64: 1, 128>}, {pipeline_mode = #tpu.pipeline_mode<synchronous>, transform_indices = @transform_5, window_bounds = array<i64: 128, 128>}, {pipeline_mode = #tpu.pipeline_mode<synchronous>, transform_indices = @transform_6, window_bounds = array<i64: 1, 128>}, {transform_indices = @transform_7, window_bounds = array<i64: 8, 10>}]} {
    %c0 = arith.constant 0 : index
    %c0_0 = arith.constant 0 : index
    %0 = vector.load %arg1[%c0, %c0_0] : memref<8x784xf32, #tpu.memory_space<vmem>>, vector<8x784xf32>
    %c0_1 = arith.constant 0 : index
    %c0_2 = arith.constant 0 : index
    %1 = vector.load %arg2[%c0_1, %c0_2] : memref<784x128xf32, #tpu.memory_space<vmem>>, vector<784x128xf32>
    %cst = arith.constant dense<0.000000e+00> : vector<8x128xf32>
    %2 = tpu.matmul %0, %1, %cst {dimension_numbers = #tpu.dot_dimension_numbers<[1], [0], [0], [1], [0, 0, 1, 1], [], []>} : vector<8x784xf32>, vector<784x128xf32>, vector<8x128xf32> -> vector<8x128xf32>
    %c0_3 = arith.constant 0 : index
    %c0_4 = arith.constant 0 : index
    %3 = vector.load %arg3[%c0_3, %c0_4] : memref<1x128xf32, #tpu.memory_space<vmem>>, vector<1x128xf32>
    %4 = vector.broadcast %3 : vector<1x128xf32> to vector<8x128xf32>
    %5 = arith.addf %2, %4 : vector<8x128xf32>
    %cst_5 = arith.constant 0.000000e+00 : f32
    %6 = vector.broadcast %cst_5 : f32 to vector<8x128xf32>
    %7 = arith.maximumf %5, %6 : vector<8x128xf32>
    %c0_6 = arith.constant 0 : index
    %c0_7 = arith.constant 0 : index
    %8 = vector.load %arg4[%c0_6, %c0_7] : memref<128x128xf32, #tpu.memory_space<vmem>>, vector<128x128xf32>
    %cst_8 = arith.constant dense<0.000000e+00> : vector<8x128xf32>
    %9 = tpu.matmul %7, %8, %cst_8 {dimension_numbers = #tpu.dot_dimension_numbers<[1], [0], [0], [1], [0, 0, 1, 1], [], []>} : vector<8x128xf32>, vector<128x128xf32>, vector<8x128xf32> -> vector<8x128xf32>
    %c0_9 = arith.constant 0 : index
    %c0_10 = arith.constant 0 : index
    %10 = vector.load %arg5[%c0_9, %c0_10] : memref<1x128xf32, #tpu.memory_space<vmem>>, vector<1x128xf32>
    %11 = vector.broadcast %10 : vector<1x128xf32> to vector<8x128xf32>
    %12 = arith.addf %9, %11 : vector<8x128xf32>
    %cst_11 = arith.constant 0.000000e+00 : f32
    %13 = vector.broadcast %cst_11 : f32 to vector<8x128xf32>
    %14 = arith.maximumf %12, %13 : vector<8x128xf32>
    %c0_12 = arith.constant 0 : index
    %c0_13 = arith.constant 0 : index
    %15 = vector.load %arg6[%c0_12, %c0_13] : memref<128x128xf32, #tpu.memory_space<vmem>>, vector<128x128xf32>
    %cst_14 = arith.constant dense<0.000000e+00> : vector<8x128xf32>
    %16 = tpu.matmul %14, %15, %cst_14 {dimension_numbers = #tpu.dot_dimension_numbers<[1], [0], [0], [1], [0, 0, 1, 1], [], []>} : vector<8x128xf32>, vector<128x128xf32>, vector<8x128xf32> -> vector<8x128xf32>
    %c0_15 = arith.constant 0 : index
    %c0_16 = arith.constant 0 : index
    %17 = vector.load %arg7[%c0_15, %c0_16] : memref<1x128xf32, #tpu.memory_space<vmem>>, vector<1x128xf32>
    %18 = vector.broadcast %17 : vector<1x128xf32> to vector<8x128xf32>
    %19 = arith.addf %16, %18 : vector<8x128xf32>
    %20 = tpu.iota {dimensions = array<i32: 1>} : vector<8x128xi32>
    %c10_i32 = arith.constant 10 : i32
    %21 = vector.broadcast %c10_i32 : i32 to vector<8x128xi32>
    %22 = arith.cmpi slt, %20, %21 : vector<8x128xi32>
    %cst_17 = arith.constant 0xFF800000 : f32
    %23 = vector.broadcast %cst_17 : f32 to vector<8x128xf32>
    %24 = arith.select %22, %19, %23 : vector<8x128xi1>, vector<8x128xf32>
    %cst_18 = arith.constant dense<0xFF800000> : vector<8xf32>
    %25 = vector.multi_reduction <maximumf>, %24, %cst_18 [1] : vector<8x128xf32> to vector<8xf32>
    %26 = vector.shape_cast %25 : vector<8xf32> to vector<8x1xf32>
    %27 = vector.broadcast %26 : vector<8x1xf32> to vector<8x128xf32>
    %28 = arith.subf %24, %27 : vector<8x128xf32>
    %29 = math.exp %28 : vector<8x128xf32>
    %cst_19 = arith.constant dense<0.000000e+00> : vector<8xf32>
    %30 = vector.multi_reduction <add>, %29, %cst_19 [1] : vector<8x128xf32> to vector<8xf32>
    %31 = vector.shape_cast %30 : vector<8xf32> to vector<8x1xf32>
    %32 = math.log %31 : vector<8x1xf32>
    %33 = vector.broadcast %32 : vector<8x1xf32> to vector<8x128xf32>
    %34 = arith.subf %28, %33 : vector<8x128xf32>
    %35 = vector.extract_strided_slice %34 {offsets = [0, 0], sizes = [8, 10], strides = [1, 1]} : vector<8x128xf32> to vector<8x10xf32>
    %c0_20 = arith.constant 0 : index
    %c0_21 = arith.constant 0 : index
    %36 = vector.load %arg8[%c0_20, %c0_21] : memref<8x10xf32, #tpu.memory_space<vmem>>, vector<8x10xf32>
    tpu.vector_store %arg8[%c0_20, %c0_21], %35 {strides = array<i32>} : memref<8x10xf32, #tpu.memory_space<vmem>>, vector<8x10xf32>,
    return
  }
  func.func @transform_0(%arg0: i32) -> (i32, i32) {
    %c0_i32 = arith.constant 0 : i32
    %c0_i32_0 = arith.constant 0 : i32
    return %arg0, %c0_i32 : i32, i32
  }
  func.func @transform_1(%arg0: i32) -> (i32, i32) {
    %c0_i32 = arith.constant 0 : i32
    %c0_i32_0 = arith.constant 0 : i32
    %c0_i32_1 = arith.constant 0 : i32
    return %c0_i32, %c0_i32_0 : i32, i32
  }
  func.func @transform_2(%arg0: i32) -> (i32, i32) {
    %c0_i32 = arith.constant 0 : i32
    %c0_i32_0 = arith.constant 0 : i32
    %c0_i32_1 = arith.constant 0 : i32
    return %c0_i32, %c0_i32_0 : i32, i32
  }
  func.func @transform_3(%arg0: i32) -> (i32, i32) {
    %c0_i32 = arith.constant 0 : i32
    %c0_i32_0 = arith.constant 0 : i32
    %c0_i32_1 = arith.constant 0 : i32
    return %c0_i32, %c0_i32_0 : i32, i32
  }
  func.func @transform_4(%arg0: i32) -> (i32, i32) {
    %c0_i32 = arith.constant 0 : i32
    %c0_i32_0 = arith.constant 0 : i32
    %c0_i32_1 = arith.constant 0 : i32
    return %c0_i32, %c0_i32_0 : i32, i32
  }
  func.func @transform_5(%arg0: i32) -> (i32, i32) {
    %c0_i32 = arith.constant 0 : i32
    %c0_i32_0 = arith.constant 0 : i32
    %c0_i32_1 = arith.constant 0 : i32
    return %c0_i32, %c0_i32_0 : i32, i32
  }
  func.func @transform_6(%arg0: i32) -> (i32, i32) {
    %c0_i32 = arith.constant 0 : i32
    %c0_i32_0 = arith.constant 0 : i32
    %c0_i32_1 = arith.constant 0 : i32
    return %c0_i32, %c0_i32_0 : i32, i32
  }
  func.func @transform_7(%arg0: i32) -> (i32, i32) {
    %c0_i32 = arith.constant 0 : i32
    %c0_i32_0 = arith.constant 0 : i32
    return %arg0, %c0_i32 : i32, i32
  }
}

</mosaic_0001>

<bundles_post_ra>
// kernel: model_a_forward.1
= control target key start
LH: loop header
LB: loop body
LE: loop exit
PB: predicated region body
PF: predicated region fallthrough
CT: control target
= control target key end

     0   :  { %vm138_vm0 = vcmask 130048   ;;  %vm860_vm1 = vmmov 0   ;;  %vm624_vm3 = vcmask 80896   ;;  %s1364_s1 = inlined_call_operand.vmem [shape: f32[784,128], index: 1, kind: input, shape index: {}]   ;;  %s1365_s0 = inlined_call_operand.vmem [shape: f32[8,784], index: 0, kind: input, shape index: {}]   ;;  %s1366_s3 = inlined_call_operand.vmem [shape: f32[128,128], index: 3, kind: input, shape index: {}]   ;;  %s1367_s5 = inlined_call_operand.vmem [shape: f32[128,128], index: 5, kind: input, shape index: {}]   ;;  %s1368_s2 = inlined_call_operand.vmem [shape: f32[1,128], index: 2, kind: input, shape index: {}]   ;;  %s1369_s4 = inlined_call_operand.vmem [shape: f32[1,128], index: 4, kind: input, shape index: {}]   ;;  %s1370_s6 = inlined_call_operand.vmem [shape: f32[1,128], index: 6, kind: input, shape index: {}]   ;;  %s1371_s7 = inlined_call_operand.vmem [shape: f32[8,10], index: 7, kind: output, shape index: {}]  }
   0x1   :  { %v64_v0 = vld [vmem:[%s1364_s1 + $0xf8] sm:$0xff]  ;;  %v63_v2 = vld [vmem:[%s1364_s1 + $0xf0] sm:$0xff]  ;;  %v62_v6 = vld [vmem:[%s1364_s1 + $0xe8] sm:$0xff] }
   0x2   :  { %v48_v1 = vld [vmem:[%s1364_s1 + $0x78] sm:$0xff]  ;;  %634 = vmatprep.subr.mxu0 %v64_v0  ;;  %v47_v4 = vld [vmem:[%s1364_s1 + $0x70] sm:$0xff]  ;;  %v46_v8 = vld [vmem:[%s1364_s1 + $0x68] sm:$0xff] }
   0x3   :  { %v96_v3 = vld [vmem:[%s1364_s1 + $0x1f8] sm:$0xff]  ;;  %635 = vmatpush3.msra.mxu0 %v48_v1  ;;  %v95_v7 = vld [vmem:[%s1364_s1 + $0x1f0] sm:$0xff]  ;;  %v94_v10 = vld [vmem:[%s1364_s1 + $0x1e8] sm:$0xff] }
   0x4   :  { %v80_v5 = vld [vmem:[%s1364_s1 + $0x178] sm:$0xff]  ;;  %669 = vmatprep.subr.mxu1 %v96_v3  ;;  %636 = vmatprep.subr.mxu0 %v63_v2  ;;  %v79_v9 = vld [vmem:[%s1364_s1 + $0x170] sm:$0xff]  ;;  %v61_v11 = vld [vmem:[%s1364_s1 + $0xe0] sm:$0xff] }
   0x5   :  { %670 = vmatpush3.msra.mxu1 %v80_v5  ;;  %637 = vmatpush3.msra.mxu0 %v47_v4  ;;  %v78_v12 = vld [vmem:[%s1364_s1 + $0x168] sm:$0xff]  ;;  %v45_v13 = vld [vmem:[%s1364_s1 + $0x60] sm:$0xff]  ;;  %v60_v15 = vld [vmem:[%s1364_s1 + $0xd8] sm:$0xff] }
   0x6   :  { %671 = vmatprep.subr.mxu1 %v95_v7  ;;  %638 = vmatprep.subr.mxu0 %v62_v6  ;;  %v93_v14 = vld [vmem:[%s1364_s1 + $0x1e0] sm:$0xff]  ;;  %v44_v17 = vld [vmem:[%s1364_s1 + $0x58] sm:$0xff]  ;;  %v59_v19 = vld [vmem:[%s1364_s1 + $0xd0] sm:$0xff] }
   0x7   :  { %672 = vmatpush3.msra.mxu1 %v79_v9  ;;  %639 = vmatpush3.msra.mxu0 %v46_v8  ;;  %v77_v16 = vld [vmem:[%s1364_s1 + $0x160] sm:$0xff]  ;;  %v92_v18 = vld [vmem:[%s1364_s1 + $0x1d8] sm:$0xff]  ;;  %v43_v21 = vld [vmem:[%s1364_s1 + $0x50] sm:$0xff] }
   0x8   :  { %673 = vmatprep.subr.mxu1 %v94_v10  ;;  %640 = vmatprep.subr.mxu0 %v61_v11  ;;  %v76_v20 = vld [vmem:[%s1364_s1 + $0x158] sm:$0xff]  ;;  %v91_v22 = vld [vmem:[%s1364_s1 + $0x1d0] sm:$0xff]  ;;  %v58_v23 = vld [vmem:[%s1364_s1 + $0xc8] sm:$0xff] }
   0x9   :  { %674 = vmatpush3.msra.mxu1 %v78_v12  ;;  %641 = vmatpush3.msra.mxu0 %v45_v13  ;;  %v75_v24 = vld [vmem:[%s1364_s1 + $0x150] sm:$0xff]  ;;  %v42_v25 = vld [vmem:[%s1364_s1 + $0x48] sm:$0xff]  ;;  %v57_v27 = vld [vmem:[%s1364_s1 + $0xc0] sm:$0xff] }
   0xa   :  { %675 = vmatprep.subr.mxu1 %v93_v14  ;;  %642 = vmatprep.subr.mxu0 %v60_v15  ;;  %v90_v26 = vld [vmem:[%s1364_s1 + $0x1c8] sm:$0xff]  ;;  %v41_v29 = vld [vmem:[%s1364_s1 + $0x40] sm:$0xff]  ;;  %v56_v31 = vld [vmem:[%s1364_s1 + $0xb8] sm:$0xff]  ;;  %v859_v14 = vmov 0.0  }
   0xb   :  { %676 = vmatpush3.msra.mxu1 %v77_v16  ;;  %643 = vmatpush3.msra.mxu0 %v44_v17  ;;  %v74_v28 = vld [vmem:[%s1364_s1 + $0x148] sm:$0xff]  ;;  %v89_v30 = vld [vmem:[%s1364_s1 + $0x1c0] sm:$0xff]  ;;  %v40_v33 = vld [vmem:[%s1364_s1 + $0x38] sm:$0xff] }
   0xc   :  { %677 = vmatprep.subr.mxu1 %v92_v18  ;;  %644 = vmatprep.subr.mxu0 %v59_v19  ;;  %v73_v32 = vld [vmem:[%s1364_s1 + $0x140] sm:$0xff]  ;;  %v88_v34 = vld [vmem:[%s1364_s1 + $0x1b8] sm:$0xff]  ;;  %v55_v35 = vld [vmem:[%s1364_s1 + $0xb0] sm:$0xff] }
   0xd   :  { %678 = vmatpush3.msra.mxu1 %v76_v20  ;;  %645 = vmatpush3.msra.mxu0 %v43_v21  ;;  %v72_v36 = vld [vmem:[%s1364_s1 + $0x138] sm:$0xff]  ;;  %v39_v37 = vld [vmem:[%s1364_s1 + $0x30] sm:$0xff]  ;;  %v54_v39 = vld [vmem:[%s1364_s1 + $0xa8] sm:$0xff] }
   0xe   :  { %679 = vmatprep.subr.mxu1 %v91_v22  ;;  %646 = vmatprep.subr.mxu0 %v58_v23  ;;  %v87_v38 = vld [vmem:[%s1364_s1 + $0x1b0] sm:$0xff]  ;;  %v38_v41 = vld [vmem:[%s1364_s1 + $0x28] sm:$0xff]  ;;  %v53_v43 = vld [vmem:[%s1364_s1 + $0xa0] sm:$0xff] }
   0xf   :  { %680 = vmatpush3.msra.mxu1 %v75_v24  ;;  %647 = vmatpush3.msra.mxu0 %v42_v25  ;;  %v71_v40 = vld [vmem:[%s1364_s1 + $0x130] sm:$0xff]  ;;  %v86_v42 = vld [vmem:[%s1364_s1 + $0x1a8] sm:$0xff]  ;;  %v37_v45 = vld [vmem:[%s1364_s1 + $0x20] sm:$0xff] }
  0x10   :  { %681 = vmatprep.subr.mxu1 %v90_v26  ;;  %648 = vmatprep.subr.mxu0 %v57_v27  ;;  %v70_v44 = vld [vmem:[%s1364_s1 + $0x128] sm:$0xff]  ;;  %v85_v46 = vld [vmem:[%s1364_s1 + $0x1a0] sm:$0xff]  ;;  %v52_v47 = vld [vmem:[%s1364_s1 + $0x98] sm:$0xff] }
  0x11   :  { %682 = vmatpush3.msra.mxu1 %v74_v28  ;;  %649 = vmatpush3.msra.mxu0 %v41_v29  ;;  %v69_v48 = vld [vmem:[%s1364_s1 + $0x120] sm:$0xff]  ;;  %v36_v49 = vld [vmem:[%s1364_s1 + $0x18] sm:$0xff]  ;;  %v51_v51 = vld [vmem:[%s1364_s1 + $0x90] sm:$0xff] }
  0x12   :  { %683 = vmatprep.subr.mxu1 %v89_v30  ;;  %650 = vmatprep.subr.mxu0 %v56_v31  ;;  %v84_v50 = vld [vmem:[%s1364_s1 + $0x198] sm:$0xff]  ;;  %v35_v53 = vld [vmem:[%s1364_s1 + $0x10] sm:$0xff]  ;;  %v50_v55 = vld [vmem:[%s1364_s1 + $0x88] sm:$0xff] }
  0x13   :  { %684 = vmatpush3.msra.mxu1 %v73_v32  ;;  %651 = vmatpush3.msra.mxu0 %v40_v33  ;;  %v68_v52 = vld [vmem:[%s1364_s1 + $0x118] sm:$0xff]  ;;  %v83_v54 = vld [vmem:[%s1364_s1 + $0x190] sm:$0xff]  ;;  %v34_v57 = vld [vmem:[%s1364_s1 + $0x8] sm:$0xff] }
  0x14   :  { %685 = vmatprep.subr.mxu1 %v88_v34  ;;  %652 = vmatprep.subr.mxu0 %v55_v35  ;;  %v67_v56 = vld [vmem:[%s1364_s1 + $0x110] sm:$0xff]  ;;  %v82_v58 = vld [vmem:[%s1364_s1 + $0x188] sm:$0xff]  ;;  %v49_v59 = vld [vmem:[%s1364_s1 + $0x80] sm:$0xff] }
  0x15   :  { %686 = vmatpush3.msra.mxu1 %v72_v36  ;;  %653 = vmatpush3.msra.mxu0 %v39_v37  ;;  %v27_v60 = vld [vmem:[%s1365_s0 + $0x8] sm:$0xff]  ;;  %v33_v61 = vld [vmem:[%s1364_s1] sm:$0xff]  ;;  %v128_v1 = vld [vmem:[%s1364_s1 + $0x2f8] sm:$0xff] }
  0x16   :  { %687 = vmatprep.subr.mxu1 %v87_v38  ;;  %654 = vmatprep.subr.mxu0 %v54_v39  ;;  %v66_v62 = vld [vmem:[%s1364_s1 + $0x108] sm:$0xff]  ;;  %v26_v63 = vld [vmem:[%s1365_s0] sm:$0xff]  ;;  %v29_v3 = vld [vmem:[%s1365_s0 + $0x18] sm:$0xff] }
  0x17   :  { %688 = vmatpush3.msra.mxu1 %v71_v40  ;;  %655 = vmatpush3.msra.mxu0 %v38_v41  ;;  %v81_v0 = vld [vmem:[%s1364_s1 + $0x180] sm:$0xff]  ;;  %v112_v4 = vld [vmem:[%s1364_s1 + $0x278] sm:$0xff]  ;;  %v28_v5 = vld [vmem:[%s1365_s0 + $0x10] sm:$0xff] }
  0x18   :  { %689 = vmatprep.subr.mxu1 %v86_v42  ;;  %656 = vmatprep.subr.mxu0 %v53_v43  ;;  %v65_v2 = vld [vmem:[%s1364_s1 + $0x100] sm:$0xff]  ;;  %v127_v6 = vld [vmem:[%s1364_s1 + $0x2f0] sm:$0xff]  ;;  %v31_v8 = vld [vmem:[%s1365_s0 + $0x28] sm:$0xff] }
  0x19   :  { %690 = vmatpush3.msra.mxu1 %v70_v44  ;;  %657 = vmatpush3.msra.mxu0 %v37_v45  ;;  %v111_v7 = vld [vmem:[%s1364_s1 + $0x270] sm:$0xff]  ;;  %v126_v9 = vld [vmem:[%s1364_s1 + $0x2e8] sm:$0xff]  ;;  %v125_v12 = vld [vmem:[%s1364_s1 + $0x2e0] sm:$0xff] }
  0x1a   :  { %691 = vmatprep.subr.mxu1 %v85_v46  ;;  %658 = vmatprep.subr.mxu0 %v52_v47  ;;  %v110_v10 = vld [vmem:[%s1364_s1 + $0x268] sm:$0xff]  ;;  %v109_v13 = vld [vmem:[%s1364_s1 + $0x260] sm:$0xff]  ;;  %v124_v16 = vld [vmem:[%s1364_s1 + $0x2d8] sm:$0xff] }
  0x1b   :  { %692 = vmatpush3.msra.mxu1 %v69_v48  ;;  %659 = vmatpush3.msra.mxu0 %v36_v49  ;;  %v130_v11 = vld [vmem:[%s1364_s1 + $0x308] sm:$0xff]  ;;  %v129_v15 = vld [vmem:[%s1364_s1 + $0x300] sm:$0xff]  ;;  %v108_v17 = vld [vmem:[%s1364_s1 + $0x258] sm:$0xff] }
  0x1c   :  { %693 = vmatprep.subr.mxu1 %v84_v50  ;;  %660 = vmatprep.subr.mxu0 %v51_v51  ;;  %v32_v18 = vld [vmem:[%s1365_s0 + $0x30] sm:$0xff]  ;;  %v122_v21 = vld [vmem:[%s1364_s1 + $0x2c8] sm:$0xff]  ;;  %v121_v23 = vld [vmem:[%s1364_s1 + $0x2c0] sm:$0xff] }
  0x1d   :  { %694 = vmatpush3.msra.mxu1 %v68_v52  ;;  %661 = vmatpush3.msra.mxu0 %v35_v53  ;;  %v123_v19 = vld [vmem:[%s1364_s1 + $0x2d0] sm:$0xff]  ;;  %v106_v22 = vld [vmem:[%s1364_s1 + $0x248] sm:$0xff]  ;;  %v105_v24 = vld [vmem:[%s1364_s1 + $0x240] sm:$0xff] }
  0x1e   :  { %695 = vmatprep.subr.mxu1 %v83_v54  ;;  %662 = vmatprep.subr.mxu0 %v50_v55  ;;  %v107_v20 = vld [vmem:[%s1364_s1 + $0x250] sm:$0xff]  ;;  %v120_v25 = vld [vmem:[%s1364_s1 + $0x2b8] sm:$0xff]  ;;  %v118_v29 = vld [vmem:[%s1364_s1 + $0x2a8] sm:$0xff] }
  0x1f   :  { %696 = vmatpush3.msra.mxu1 %v67_v56  ;;  %663 = vmatpush3.msra.mxu0 %v34_v57  ;;  %v104_v26 = vld [vmem:[%s1364_s1 + $0x238] sm:$0xff]  ;;  %v119_v27 = vld [vmem:[%s1364_s1 + $0x2b0] sm:$0xff]  ;;  %v102_v30 = vld [vmem:[%s1364_s1 + $0x228] sm:$0xff] }
  0x20   :  { %697 = vmatprep.subr.mxu1 %v82_v58  ;;  %664 = vmatprep.subr.mxu0 %v49_v59  ;;  %v103_v28 = vld [vmem:[%s1364_s1 + $0x230] sm:$0xff]  ;;  %v117_v31 = vld [vmem:[%s1364_s1 + $0x2a0] sm:$0xff]  ;;  %v116_v33 = vld [vmem:[%s1364_s1 + $0x298] sm:$0xff] }
  0x21   :  { %206 = vmatprep.mubr.f32.mxu0 %v27_v60  ;;  %665 = vmatpush3.msra.mxu0 %v33_v61  ;;  %v101_v32 = vld [vmem:[%s1364_s1 + $0x220] sm:$0xff]  ;;  %v100_v34 = vld [vmem:[%s1364_s1 + $0x218] sm:$0xff]  ;;  %v115_v35 = vld [vmem:[%s1364_s1 + $0x290] sm:$0xff] }
  0x22   :  { %698 = vmatpush3.msra.mxu1 %v66_v62  ;;  %207 = vmatmul.mubr.f32.vlgmr.msra.gmra.mxu0 %v26_v63  ;;  %v99_v36 = vld [vmem:[%s1364_s1 + $0x210] sm:$0xff]  ;;  %v114_v37 = vld [vmem:[%s1364_s1 + $0x288] sm:$0xff]  ;;  %v113_v39 = vld [vmem:[%s1364_s1 + $0x280] sm:$0xff] }
  0x23   :  { %699 = vmatprep.subr.mxu1 %v81_v0  ;;  %704 = vmatprep.subr.mxu0 %v128_v1  ;;  %v98_v38 = vld [vmem:[%s1364_s1 + $0x208] sm:$0xff]  ;;  %v97_v40 = vld [vmem:[%s1364_s1 + $0x200] sm:$0xff]  ;;  %v438_v42 = vld [vmem:[%s1366_s3 + $0x78] sm:$0xff] }
  0x24   :  { %700 = vmatpush3.msra.mxu1 %v65_v2  ;;  %276 = vmatprep.mubr.f32.mxu1 %v29_v3  ;;  %v30_v41 = vld [vmem:[%s1365_s0 + $0x20] sm:$0xff]  ;;  %v437_v43 = vld [vmem:[%s1366_s3 + $0x70] sm:$0xff]  ;;  %v436_v44 = vld [vmem:[%s1366_s3 + $0x68] sm:$0xff] }
  0x25   :  { %705 = vmatpush3.msra.mxu0 %v112_v4  ;;  %277 = vmatmul.mubr.f32.vlgmr.msra.gmra.mxu1 %v28_v5  ;;  %v435_v45 = vld [vmem:[%s1366_s3 + $0x60] sm:$0xff]  ;;  %v434_v46 = vld [vmem:[%s1366_s3 + $0x58] sm:$0xff]  ;;  %v433_v47 = vld [vmem:[%s1366_s3 + $0x50] sm:$0xff] }
  0x26   :  { %706 = vmatprep.subr.mxu0 %v127_v6  ;;  %346 = vmatprep.mubr.f32.mxu0 %v31_v8  ;;  %v432_v48 = vld [vmem:[%s1366_s3 + $0x48] sm:$0xff]  ;;  %v431_v49 = vld [vmem:[%s1366_s3 + $0x40] sm:$0xff]  ;;  %v430_v50 = vld [vmem:[%s1366_s3 + $0x38] sm:$0xff] }
  0x27   :  { %707 = vmatpush3.msra.mxu0 %v111_v7  ;;  %776 = vmatprep.subr.mxu1 %v859_v14  ;;  %v429_v51 = vld [vmem:[%s1366_s3 + $0x30] sm:$0xff]  ;;  %v428_v52 = vld [vmem:[%s1366_s3 + $0x28] sm:$0xff]  ;;  %v427_v53 = vld [vmem:[%s1366_s3 + $0x20] sm:$0xff] }
  0x28   :  { %708 = vmatprep.subr.mxu0 %v126_v9  ;;  %777 = vmatpush3.msra.mxu1 %v130_v11  ;;  %v426_v54 = vld [vmem:[%s1366_s3 + $0x18] sm:$0xff]  ;;  %v425_v55 = vld [vmem:[%s1366_s3 + $0x10] sm:$0xff]  ;;  %v424_v56 = vld [vmem:[%s1366_s3 + $0x8] sm:$0xff] }
  0x29   :  { %709 = vmatpush3.msra.mxu0 %v110_v10  ;;  %778 = vmatprep.subr.mxu1 %v859_v14  ;;  %v423_v57 = vld [vmem:[%s1366_s3] sm:$0xff]  ;;  %v532_v58 = vld [vmem:[%s1367_s5 + $0x78] sm:$0xff]  ;;  %v531_v59 = vld [vmem:[%s1367_s5 + $0x70] sm:$0xff] }
  0x2a   :  { %710 = vmatprep.subr.mxu0 %v125_v12  ;;  %779 = vmatpush3.msra.mxu1 %v129_v15  ;;  %v530_v60 = vld [vmem:[%s1367_s5 + $0x68] sm:$0xff]  ;;  %v529_v61 = vld [vmem:[%s1367_s5 + $0x60] sm:$0xff]  ;;  %v528_v62 = vld [vmem:[%s1367_s5 + $0x58] sm:$0xff] }
  0x2b   :  { %711 = vmatpush3.msra.mxu0 %v109_v13  ;;  %780 = vmatprep.mubr.msk.f32.mxu1 %vm860_vm1, %v859_v14  ;;  %v527_v63 = vld [vmem:[%s1367_s5 + $0x50] sm:$0xff]  ;;  %v526_v0 = vld [vmem:[%s1367_s5 + $0x48] sm:$0xff]  ;;  %v525_v1 = vld [vmem:[%s1367_s5 + $0x40] sm:$0xff] }
  0x2c   :  { %712 = vmatprep.subr.mxu0 %v124_v16  ;;  %781 = vmatmul.mubr.msk.f32.vlgmr.msra.gmra.mxu1 %vm138_vm0, %v32_v18  ;;  %v524_v2 = vld [vmem:[%s1367_s5 + $0x38] sm:$0xff]  ;;  %v523_v3 = vld [vmem:[%s1367_s5 + $0x30] sm:$0xff]  ;;  %v522_v4 = vld [vmem:[%s1367_s5 + $0x28] sm:$0xff] }
  0x2d   :  { %713 = vmatpush3.msra.mxu0 %v108_v17  ;;  %783 = vmatprep.subr.mxu1 %v859_v14  ;;  %v521_v5 = vld [vmem:[%s1367_s5 + $0x20] sm:$0xff]  ;;  %v520_v6 = vld [vmem:[%s1367_s5 + $0x18] sm:$0xff] }
  0x2e   :  { %714 = vmatprep.subr.mxu0 %v123_v19  ;;  %815 = vmatprep.mubr.msk.f32.mxu1 %vm860_vm1, %v859_v14  ;;  %v630_v15 = vld [vmem:[%s1368_s2] ss:$0 sm:$0xff] }
  0x2f   :  { %715 = vmatpush3.msra.mxu0 %v107_v20  ;;  %784 = vmatpush3.msra.mxu1 %v438_v42 }
  0x30   :  { %716 = vmatprep.subr.mxu0 %v122_v21  ;;  %785 = vmatprep.subr.mxu1 %v859_v14 }
  0x31   :  { %717 = vmatpush3.msra.mxu0 %v106_v22  ;;  %786 = vmatpush3.msra.mxu1 %v437_v43 }
  0x32   :  { %718 = vmatprep.subr.mxu0 %v121_v23  ;;  %787 = vmatprep.subr.mxu1 %v859_v14 }
  0x33   :  { %719 = vmatpush3.msra.mxu0 %v105_v24  ;;  %788 = vmatpush3.msra.mxu1 %v436_v44 }
  0x34   :  { %720 = vmatprep.subr.mxu0 %v120_v25  ;;  %789 = vmatprep.subr.mxu1 %v859_v14  ;;  %v519_v25 = vld [vmem:[%s1367_s5 + $0x10] sm:$0xff] }
  0x35   :  { %721 = vmatpush3.msra.mxu0 %v104_v26  ;;  %790 = vmatpush3.msra.mxu1 %v435_v45  ;;  %v518_v26 = vld [vmem:[%s1367_s5 + $0x8] sm:$0xff] }
  0x36   :  { %722 = vmatprep.subr.mxu0 %v119_v27  ;;  %791 = vmatprep.subr.mxu1 %v859_v14  ;;  %v517_v27 = vld [vmem:[%s1367_s5] sm:$0xff] }
  0x37   :  { %723 = vmatpush3.msra.mxu0 %v103_v28  ;;  %792 = vmatpush3.msra.mxu1 %v434_v46  ;;  %v632_v28 = vld [vmem:[%s1369_s4] ss:$0 sm:$0xff] }
  0x38   :  { %724 = vmatprep.subr.mxu0 %v118_v29  ;;  %793 = vmatprep.subr.mxu1 %v859_v14 }
  0x39   :  { %725 = vmatpush3.msra.mxu0 %v102_v30  ;;  %794 = vmatpush3.msra.mxu1 %v433_v47 }
  0x3a   :  { %726 = vmatprep.subr.mxu0 %v117_v31  ;;  %795 = vmatprep.subr.mxu1 %v859_v14 }
  0x3b   :  { %727 = vmatpush3.msra.mxu0 %v101_v32  ;;  %796 = vmatpush3.msra.mxu1 %v432_v48 }
  0x3c   :  { %728 = vmatprep.subr.mxu0 %v116_v33  ;;  %797 = vmatprep.subr.mxu1 %v859_v14  ;;  %v610_v33 = vlaneseq }
  0x3d   :  { %729 = vmatpush3.msra.mxu0 %v100_v34  ;;  %798 = vmatpush3.msra.mxu1 %v431_v49 }
  0x3e   :  { %730 = vmatprep.subr.mxu0 %v115_v35  ;;  %799 = vmatprep.subr.mxu1 %v859_v14  ;;  %v611_v34 = vand.u32 127, %v610_v33 }
  0x3f   :  { %731 = vmatpush3.msra.mxu0 %v99_v36  ;;  %800 = vmatpush3.msra.mxu1 %v430_v50 }
  0x40   :  { %732 = vmatprep.subr.mxu0 %v114_v37  ;;  %801 = vmatprep.subr.mxu1 %v859_v14  ;;  %vm612_vm2 = vcmp.lt.s32.totalorder %v611_v34, 10 }
  0x41   :  { %733 = vmatpush3.msra.mxu0 %v98_v38  ;;  %802 = vmatpush3.msra.mxu1 %v429_v51 }
  0x42   :  { %734 = vmatprep.subr.mxu0 %v113_v39  ;;  %803 = vmatprep.subr.mxu1 %v859_v14 }
  0x43   :  { %735 = vmatpush3.msra.mxu0 %v97_v40  ;;  %804 = vmatpush3.msra.mxu1 %v428_v52 }
  0x44   :  { %347 = vmatmul.mubr.f32.vlgmr.msra.gmra.mxu0 %v30_v41  ;;  %818 = vmatprep.subr.mxu0 %v859_v14 }
  0x45   :  { %850 = vmatprep.mubr.msk.f32.mxu0 %vm860_vm1, %v859_v14  ;;  %805 = vmatprep.subr.mxu1 %v859_v14 }
  0x46   :  { %806 = vmatpush3.msra.mxu1 %v427_v53  ;;  %819 = vmatpush3.msra.mxu0 %v532_v58 }
  0x47   :  { %807 = vmatprep.subr.mxu1 %v859_v14  ;;  %820 = vmatprep.subr.mxu0 %v859_v14 }
  0x48   :  { %808 = vmatpush3.msra.mxu1 %v426_v54  ;;  %821 = vmatpush3.msra.mxu0 %v531_v59 }
  0x49   :  { %809 = vmatprep.subr.mxu1 %v859_v14  ;;  %822 = vmatprep.subr.mxu0 %v859_v14 }
  0x4a   :  { %810 = vmatpush3.msra.mxu1 %v425_v55  ;;  %823 = vmatpush3.msra.mxu0 %v530_v60 }
  0x4b   :  { %811 = vmatprep.subr.mxu1 %v859_v14  ;;  %824 = vmatprep.subr.mxu0 %v859_v14 }
  0x4c   :  { %812 = vmatpush3.msra.mxu1 %v424_v56  ;;  %825 = vmatpush3.msra.mxu0 %v529_v61 }
  0x4d   :  { %813 = vmatprep.subr.mxu1 %v859_v14  ;;  %826 = vmatprep.subr.mxu0 %v859_v14 }
  0x4e   :  { %814 = vmatpush3.msra.mxu1 %v423_v57  ;;  %827 = vmatpush3.msra.mxu0 %v528_v62 }
  0x4f   :  { %828 = vmatprep.subr.mxu0 %v859_v14 }
  0x50   :  { %829 = vmatpush3.msra.mxu0 %v527_v63 }
  0x51   :  { %830 = vmatprep.subr.mxu0 %v859_v14 }
  0x52   :  { %831 = vmatpush3.msra.mxu0 %v526_v0 }
  0x53   :  { %832 = vmatprep.subr.mxu0 %v859_v14 }
  0x54   :  { %833 = vmatpush3.msra.mxu0 %v525_v1 }
  0x55   :  { %834 = vmatprep.subr.mxu0 %v859_v14 }
  0x56   :  { %835 = vmatpush3.msra.mxu0 %v524_v2 }
  0x57   :  { %836 = vmatprep.subr.mxu0 %v859_v14 }
  0x58   :  { %837 = vmatpush3.msra.mxu0 %v523_v3 }
  0x59   :  { %838 = vmatprep.subr.mxu0 %v859_v14 }
  0x5a   :  { %839 = vmatpush3.msra.mxu0 %v522_v4 }
  0x5b   :  { %840 = vmatprep.subr.mxu0 %v859_v14 }
  0x5c   :  { %841 = vmatpush3.msra.mxu0 %v521_v5 }
  0x5d   :  { %842 = vmatprep.subr.mxu0 %v859_v14 }
  0x5e   :  { %843 = vmatpush3.msra.mxu0 %v520_v6 }
  0x5f   :  { %844 = vmatprep.subr.mxu0 %v859_v14 }
  0x60   :  { %845 = vmatpush3.msra.mxu0 %v519_v25 }
  0x61   :  { %846 = vmatprep.subr.mxu0 %v859_v14 }
  0x62   :  { %847 = vmatpush3.msra.mxu0 %v518_v26 }
  0x63   :  { %848 = vmatprep.subr.mxu0 %v859_v14  ;;  %v633_v14 = vld [vmem:[%s1370_s6] ss:$0 sm:$0xff] }
  0x64   :  { %849 = vmatpush3.msra.mxu0 %v517_v27 }
  0xe2   :  { %v666_v11 = vpop.f32.mrf.mxu0 }
  0xe4   :  { %v667_v12 = vpop.f32.mrf.mxu0 }
  0xe5   :  { %v701_v7 = vpop.f32.mrf.mxu1  ;;  %v668_v13 = vadd.f32 %v667_v12, %v666_v11 }
  0xe7   :  { %v702_v8 = vpop.f32.mrf.mxu1  ;;  %v209_v16 = vadd.f32 %v668_v13, %v630_v15 }
  0xe8   :  { %v703_v17 = vadd.f32 %v702_v8, %v701_v7 }
  0xea   :  { %v279_v20 = vadd.f32 %v703_v17, %v209_v16 }
  0xec   :  { %v418_v9 = vpop.f32.mrf.mxu1 }
  0xee   :  { %v782_v10 = vpop.f32.mrf.mxu1 }
 0x104   :  { %v736_v18 = vpop.f32.mrf.mxu0 }
 0x106   :  { %v737_v19 = vpop.f32.mrf.mxu0 }
 0x107   :  { %v738_v21 = vadd.f32 %v737_v19, %v736_v18 }
 0x109   :  { %v349_v22 = vadd.f32 %v738_v21, %v279_v20 }
 0x10b   :  { %v419_v23 = vadd.f32 %v418_v9, %v349_v22 }
 0x10d   :  { %v422_v24 = vmax.f32 %v419_v23, 0.0 }
 0x10f   :  { %816 = vmatmul.mubr.f32.vlgmr.msra.gmra.mxu1 %v422_v24 }
 0x1cf   :  { %v512_v29 = vpop.f32.mrf.mxu1 }
 0x1d0   :  { %v513_v30 = vadd.f32 %v632_v28, %v512_v29 }
 0x1d1   :  { %v817_v31 = vpop.f32.mrf.mxu1 }
 0x1d2   :  { %v516_v32 = vmax.f32 %v513_v30, 0.0 }
 0x1d4   :  { %851 = vmatmul.mubr.f32.vlgmr.msra.gmra.mxu0 %v516_v32 }
 0x294   :  { %v606_v35 = vpop.f32.mrf.mxu0 }
 0x295   :  { %v607_v36 = vadd.f32 %v633_v14, %v606_v35 }
 0x296   :  { %v852_v37 = vpop.f32.mrf.mxu0 }
 0x297   :  { %v613_v38 = vsel %vm612_vm2, %v607_v36, -inf }
 0x298   :  { %614 = vmax.xlane.f32.xlu0 %v613_v38 }
 0x321   :  { %v615_v39 = vpop.xlane.xlu0 %614 }
 0x322   :  { %v616_v40 = vsub.f32 %v613_v38, %v615_v39 }
 0x324   :  { %v617_v41 = vmul.f32 1.442695, %v616_v40 }
 0x326   :  { %855 = vpow2.f32 %v617_v41 }
 0x333   :  { %v856_v42 = vpop.eup %855 }
 0x334   :  { %619 = vadd.xlane.f32.xlu0 %v856_v42 }
 0x3bd   :  { %v620_v43 = vpop.xlane.xlu0 %619 }
 0x3be   :  { %857 = vlog2.f32 %v620_v43 }
 0x3cb   :  { %v858_v44 = vpop.eup %857 }
 0x3cc   :  { %v622_v45 = vmul.f32 0.6931472, %v858_v44 }
 0x3ce   :  { %v623_v46 = vsub.f32 %v616_v40, %v622_v45 }
 0x3d0   :  { %625 = vst.msk [vmem:[%s1371_s7] sm:$0xff] %vm624_vm3, %v623_v46 }

</bundles_post_ra>
